<compile_context>
chip_gen: v7x
topology: tpu7x:2x2x1
jax: 0.10.0
libtpu: 0.0.40
codegen_flags: <defaults>
</compile_context>

<pallas_src>
import jax
import jax.numpy as jnp
from jax.experimental import pallas as pl
from jax.experimental.pallas import tpu as pltpu

_TARGET_BLOCK_BYTES = 2 * 1024 * 1024   # ~2 MiB per input block
_VMEM_LIMIT_BYTES = 32 * 1024 * 1024    # safe on v5e / v6e / v7x


def _dice_partials_kernel(p_ref, t_ref, inter_ref, denom_ref, acc_ref):
    """Per-core partial sums of (p*t) and (p+t) over channel-0 pixels."""
    b = pl.program_id(1)

    @pl.when(b == 0)
    def _init():
        acc_ref[...] = jnp.zeros_like(acc_ref)

    # Blocks are (TN, 1, H, W); drop the unit channel dim (free squeeze) and
    # upcast to f32 for accumulation.
    p = p_ref[...].astype(jnp.float32)[:, 0]   # (TN, H, W)
    t = t_ref[...].astype(jnp.float32)[:, 0]   # (TN, H, W)

    # Reduce only over the leading batch dim: pure vreg adds (VALU), no XLU.
    acc_ref[0] += jnp.sum(p * t, axis=0)       # (H, W)
    acc_ref[1] += jnp.sum(p + t, axis=0)       # (H, W)

    @pl.when(b == pl.num_programs(1) - 1)
    def _finalize():
        # One cross-lane (XLU) reduction per core, done exactly once.
        inter = jnp.sum(acc_ref[0])
        denom = jnp.sum(acc_ref[1])
        inter_ref[...] = jnp.broadcast_to(inter, inter_ref.shape)
        denom_ref[...] = jnp.broadcast_to(denom, denom_ref.shape)


def _choose_tiling(n, h, w, itemsize):
    """Pick a batch tile TN (divides N) and a core-split NC for the grid."""
    bytes_per_image = max(1, h * w * itemsize)
    tn_cap = max(1, _TARGET_BLOCK_BYTES // bytes_per_image)
    tn_cap = min(tn_cap, n)
    if n >= 2:
        # Keep at least two batch blocks so the stream can be split across the
        # two v7x TensorCores (harmless on 1-TC v5e/v6e).
        tn_cap = min(tn_cap, max(1, n // 2))
    tn = max(d for d in range(1, n + 1) if n % d == 0 and d <= tn_cap)
    num_blocks = n // tn
    nc = 2 if (num_blocks >= 2 and num_blocks % 2 == 0) else 1
    nb = num_blocks // nc
    return tn, nc, nb


def dice_loss(y_pred, y_true, smooth=1.0):
    assert y_pred.shape == y_true.shape
    n, c, h, w = y_pred.shape
    itemsize = max(jnp.dtype(y_pred.dtype).itemsize,
                   jnp.dtype(y_true.dtype).itemsize)
    tn, nc, nb = _choose_tiling(n, h, w, itemsize)

    # Channel selection happens here: channel block index is pinned to 0, so
    # only y[:, 0] is ever read from HBM.
    in_spec = pl.BlockSpec((tn, 1, h, w), lambda ci, bi: (ci * nb + bi, 0, 0, 0))
    out_spec = pl.BlockSpec((1, 1, 128), lambda ci, bi: (ci, 0, 0))

    inter_p, denom_p = pl.pallas_call(
        _dice_partials_kernel,
        out_shape=(
            jax.ShapeDtypeStruct((nc, 1, 128), jnp.float32),
            jax.ShapeDtypeStruct((nc, 1, 128), jnp.float32),
        ),
        grid_spec=pltpu.PrefetchScalarGridSpec(
            num_scalar_prefetch=0,
            grid=(nc, nb),
            in_specs=[in_spec, in_spec],
            out_specs=[out_spec, out_spec],
            scratch_shapes=[pltpu.VMEM((2, h, w), jnp.float32)],
        ),
        compiler_params=pltpu.CompilerParams(
            dimension_semantics=("parallel", "arbitrary"),
            vmem_limit_bytes=_VMEM_LIMIT_BYTES,
        ),
    )(y_pred, y_true)

    # Combine per-core partials and finish the dice expression (a handful of
    # scalar ops).
    intersection = jnp.sum(inter_p[:, 0, 0])
    denom = jnp.sum(denom_p[:, 0, 0])
    dsc = (2.0 * intersection + smooth) / (denom + smooth)
    return 1.0 - dsc


def _dice_loss_ref(y_pred, y_true, smooth=1.0):
    p = y_pred[:, 0].reshape(-1).astype(jnp.float32)
    t = y_true[:, 0].reshape(-1).astype(jnp.float32)
    inter = jnp.sum(p * t)
    dsc = (2.0 * inter + smooth) / (jnp.sum(p) + jnp.sum(t) + smooth)
    return 1.0 - dsc


if __name__ == "__main__":
    key = jax.random.PRNGKey(0)
    k1, k2 = jax.random.split(key)
    # NCHW, batch=2, channels=4, spatial=16
    y_pred = jax.nn.sigmoid(jax.random.normal(k1, (2, 4, 16, 16), dtype=jnp.float32))
    y_true = (jax.random.uniform(k2, (2, 4, 16, 16)) > 0.5).astype(jnp.float32)

    loss = dice_loss(y_pred, y_true)
    jax.block_until_ready(loss)

    ref = _dice_loss_ref(y_pred, y_true)
    assert jnp.allclose(loss, ref, atol=1e-5, rtol=1e-5), (loss, ref)
    print("KERNEL_OK")
</pallas_src>

<mosaic_0001>
module attributes {stable_mosaic.version = 11 : i64} {
  func.func @_dice_partials_kernel(%arg0: i32, %arg1: i32, %arg2: memref<1x1x16x16xf32, #tpu.memory_space<vmem>>, %arg3: memref<1x1x16x16xf32, #tpu.memory_space<vmem>>, %arg4: memref<1x1x128xf32, #tpu.memory_space<vmem>>, %arg5: memref<1x1x128xf32, #tpu.memory_space<vmem>>, %arg6: memref<2x16x16xf32, #tpu.memory_space<vmem>>) attributes {dimension_semantics = [#tpu.dimension_semantics<parallel>, #tpu.dimension_semantics<arbitrary>], iteration_bounds = array<i64: 2, 1>, scalar_prefetch = 0 : i64, scratch_operands = 1 : i64, tpu.core_type = #tpu.core_type<tc>, window_params = [{transform_indices = @transform_0, window_bounds = array<i64: 1, 1, 16, 16>}, {transform_indices = @transform_1, window_bounds = array<i64: 1, 1, 16, 16>}, {transform_indices = @transform_2, window_bounds = array<i64: 1, 1, 128>}, {transform_indices = @transform_3, window_bounds = array<i64: 1, 1, 128>}]} {
    %c0_i32 = arith.constant 0 : i32
    %0 = arith.cmpi eq, %arg1, %c0_i32 : i32
    %1 = arith.extui %0 : i1 to i32
    %c0_i32_0 = arith.constant 0 : i32
    %2 = arith.cmpi ne, %1, %c0_i32_0 : i32
    scf.if %2 {
      %cst_22 = arith.constant 0.000000e+00 : f32
      %26 = vector.broadcast %cst_22 : f32 to vector<2x16x16xf32>
      %c0_23 = arith.constant 0 : index
      %c0_24 = arith.constant 0 : index
      %c0_25 = arith.constant 0 : index
      %27 = vector.load %arg6[%c0_23, %c0_24, %c0_25] : memref<2x16x16xf32, #tpu.memory_space<vmem>>, vector<2x16x16xf32>
      tpu.vector_store %arg6[%c0_23, %c0_24, %c0_25], %26 {strides = array<i32>} : memref<2x16x16xf32, #tpu.memory_space<vmem>>, vector<2x16x16xf32>,
    } else {
    }
    %c0 = arith.constant 0 : index
    %c0_1 = arith.constant 0 : index
    %c0_2 = arith.constant 0 : index
    %c0_3 = arith.constant 0 : index
    %3 = vector.load %arg2[%c0, %c0_1, %c0_2, %c0_3] : memref<1x1x16x16xf32, #tpu.memory_space<vmem>>, vector<1x1x16x16xf32>
    %4 = vector.shape_cast %3 : vector<1x1x16x16xf32> to vector<1x16x16xf32>
    %c0_4 = arith.constant 0 : index
    %c0_5 = arith.constant 0 : index
    %c0_6 = arith.constant 0 : index
    %c0_7 = arith.constant 0 : index
    %5 = vector.load %arg3[%c0_4, %c0_5, %c0_6, %c0_7] : memref<1x1x16x16xf32, #tpu.memory_space<vmem>>, vector<1x1x16x16xf32>
    %6 = vector.shape_cast %5 : vector<1x1x16x16xf32> to vector<1x16x16xf32>
    %c0_8 = arith.constant 0 : index
    %c0_9 = arith.constant 0 : index
    %c0_10 = arith.constant 0 : index
    %7 = vector.load %arg6[%c0_8, %c0_9, %c0_10] : memref<2x16x16xf32, #tpu.memory_space<vmem>>, vector<1x16x16xf32>
    %8 = vector.shape_cast %7 : vector<1x16x16xf32> to vector<16x16xf32>
    %9 = arith.mulf %4, %6 : vector<1x16x16xf32>
    %cst = arith.constant dense<0.000000e+00> : vector<16x16xf32>
    %10 = vector.multi_reduction <add>, %9, %cst [0] : vector<1x16x16xf32> to vector<16x16xf32>
    %11 = arith.addf %8, %10 : vector<16x16xf32>
    %c0_11 = arith.constant 0 : index
    %c0_12 = arith.constant 0 : index
    %c0_13 = arith.constant 0 : index
    %12 = vector.load %arg6[%c0_11, %c0_12, %c0_13] : memref<2x16x16xf32, #tpu.memory_space<vmem>>, vector<1x16x16xf32>
    %13 = vector.shape_cast %12 : vector<1x16x16xf32> to vector<16x16xf32>
    %14 = vector.shape_cast %11 : vector<16x16xf32> to vector<1x16x16xf32>
    tpu.vector_store %arg6[%c0_11, %c0_12, %c0_13], %14 {strides = array<i32>} : memref<2x16x16xf32, #tpu.memory_space<vmem>>, vector<1x16x16xf32>,
    %c1 = arith.constant 1 : index
    %c0_14 = arith.constant 0 : index
    %c0_15 = arith.constant 0 : index
    %15 = vector.load %arg6[%c1, %c0_14, %c0_15] : memref<2x16x16xf32, #tpu.memory_space<vmem>>, vector<1x16x16xf32>
    %16 = vector.shape_cast %15 : vector<1x16x16xf32> to vector<16x16xf32>
    %17 = arith.addf %4, %6 : vector<1x16x16xf32>
    %cst_16 = arith.constant dense<0.000000e+00> : vector<16x16xf32>
    %18 = vector.multi_reduction <add>, %17, %cst_16 [0] : vector<1x16x16xf32> to vector<16x16xf32>
    %19 = arith.addf %16, %18 : vector<16x16xf32>
    %c1_17 = arith.constant 1 : index
    %c0_18 = arith.constant 0 : index
    %c0_19 = arith.constant 0 : index
    %20 = vector.load %arg6[%c1_17, %c0_18, %c0_19] : memref<2x16x16xf32, #tpu.memory_space<vmem>>, vector<1x16x16xf32>
    %21 = vector.shape_cast %20 : vector<1x16x16xf32> to vector<16x16xf32>
    %22 = vector.shape_cast %19 : vector<16x16xf32> to vector<1x16x16xf32>
    tpu.vector_store %arg6[%c1_17, %c0_18, %c0_19], %22 {strides = array<i32>} : memref<2x16x16xf32, #tpu.memory_space<vmem>>, vector<1x16x16xf32>,
    %c0_i32_20 = arith.constant 0 : i32
    %23 = arith.cmpi eq, %arg1, %c0_i32_20 : i32
    %24 = arith.extui %23 : i1 to i32
    %c0_i32_21 = arith.constant 0 : i32
    %25 = arith.cmpi ne, %24, %c0_i32_21 : i32
    scf.if %25 {
      %c0_22 = arith.constant 0 : index
      %c0_23 = arith.constant 0 : index
      %c0_24 = arith.constant 0 : index
      %26 = vector.load %arg6[%c0_22, %c0_23, %c0_24] : memref<2x16x16xf32, #tpu.memory_space<vmem>>, vector<1x16x16xf32>
      %27 = vector.shape_cast %26 : vector<1x16x16xf32> to vector<16x16xf32>
      %28 = vector.shape_cast %27 : vector<16x16xf32> to vector<1x16x16xf32>
      %cst_25 = arith.constant dense<0.000000e+00> : vector<1xf32>
      %29 = vector.multi_reduction <add>, %28, %cst_25 [1, 2] : vector<1x16x16xf32> to vector<1xf32>
      %30 = vector.shape_cast %29 : vector<1xf32> to vector<1x1x1xf32>
      %31 = vector.extract %30[0, 0, 0] : f32 from vector<1x1x1xf32>
      %c1_26 = arith.constant 1 : index
      %c0_27 = arith.constant 0 : index
      %c0_28 = arith.constant 0 : index
      %32 = vector.load %arg6[%c1_26, %c0_27, %c0_28] : memref<2x16x16xf32, #tpu.memory_space<vmem>>, vector<1x16x16xf32>
      %33 = vector.shape_cast %32 : vector<1x16x16xf32> to vector<16x16xf32>
      %34 = vector.shape_cast %33 : vector<16x16xf32> to vector<1x16x16xf32>
      %cst_29 = arith.constant dense<0.000000e+00> : vector<1xf32>
      %35 = vector.multi_reduction <add>, %34, %cst_29 [1, 2] : vector<1x16x16xf32> to vector<1xf32>
      %36 = vector.shape_cast %35 : vector<1xf32> to vector<1x1x1xf32>
      %37 = vector.extract %36[0, 0, 0] : f32 from vector<1x1x1xf32>
      %38 = vector.broadcast %31 : f32 to vector<1x1x128xf32>
      %c0_30 = arith.constant 0 : index
      %c0_31 = arith.constant 0 : index
      %c0_32 = arith.constant 0 : index
      %39 = vector.load %arg4[%c0_30, %c0_31, %c0_32] : memref<1x1x128xf32, #tpu.memory_space<vmem>>, vector<1x1x128xf32>
      tpu.vector_store %arg4[%c0_30, %c0_31, %c0_32], %38 {strides = array<i32>} : memref<1x1x128xf32, #tpu.memory_space<vmem>>, vector<1x1x128xf32>,
      %40 = vector.broadcast %37 : f32 to vector<1x1x128xf32>
      %c0_33 = arith.constant 0 : index
      %c0_34 = arith.constant 0 : index
      %c0_35 = arith.constant 0 : index
      %41 = vector.load %arg5[%c0_33, %c0_34, %c0_35] : memref<1x1x128xf32, #tpu.memory_space<vmem>>, vector<1x1x128xf32>
      tpu.vector_store %arg5[%c0_33, %c0_34, %c0_35], %40 {strides = array<i32>} : memref<1x1x128xf32, #tpu.memory_space<vmem>>, vector<1x1x128xf32>,
    } else {
    }
    return
  }
  func.func @transform_0(%arg0: i32, %arg1: i32) -> (i32, i32, i32, i32) {
    %c1_i32 = arith.constant 1 : i32
    %0 = arith.muli %arg0, %c1_i32 : i32
    %1 = arith.addi %0, %arg1 : i32
    %c0_i32 = arith.constant 0 : i32
    %c0_i32_0 = arith.constant 0 : i32
    %c0_i32_1 = arith.constant 0 : i32
    %c0_i32_2 = arith.constant 0 : i32
    return %1, %c0_i32, %c0_i32_0, %c0_i32_1 : i32, i32, i32, i32
  }
  func.func @transform_1(%arg0: i32, %arg1: i32) -> (i32, i32, i32, i32) {
    %c1_i32 = arith.constant 1 : i32
    %0 = arith.muli %arg0, %c1_i32 : i32
    %1 = arith.addi %0, %arg1 : i32
    %c0_i32 = arith.constant 0 : i32
    %c0_i32_0 = arith.constant 0 : i32
    %c0_i32_1 = arith.constant 0 : i32
    %c0_i32_2 = arith.constant 0 : i32
    return %1, %c0_i32, %c0_i32_0, %c0_i32_1 : i32, i32, i32, i32
  }
  func.func @transform_2(%arg0: i32, %arg1: i32) -> (i32, i32, i32) {
    %c0_i32 = arith.constant 0 : i32
    %c0_i32_0 = arith.constant 0 : i32
    %c0_i32_1 = arith.constant 0 : i32
    return %arg0, %c0_i32, %c0_i32_0 : i32, i32, i32
  }
  func.func @transform_3(%arg0: i32, %arg1: i32) -> (i32, i32, i32) {
    %c0_i32 = arith.constant 0 : i32
    %c0_i32_0 = arith.constant 0 : i32
    %c0_i32_1 = arith.constant 0 : i32
    return %arg0, %c0_i32, %c0_i32_0 : i32, i32, i32
  }
}

</mosaic_0001>

<bundles_post_ra>
// kernel: tpu_custom_call.1
= control target key start
LH: loop header
LB: loop body
LE: loop exit
PB: predicated region body
PF: predicated region fallthrough
CT: control target
= control target key end

     0   :  { %9 = vsyncpa [#allocation4], 0  ;;  %s1075_s0 = inlined_call_operand.hbm [shape: f32[2,4,16,16], index: 0, kind: input, shape index: {}]   ;;  %s1076_s1 = inlined_call_operand.hbm [shape: f32[2,4,16,16], index: 1, kind: input, shape index: {}]   ;;  %s1077_s2 = inlined_call_operand.hbm [shape: f32[2,1,128], index: 2, kind: output, shape index: {0}]   ;;  %s1078_s3 = inlined_call_operand.hbm [shape: f32[2,1,128], index: 3, kind: output, shape index: {1}]  }
   0x1   :  { %11 = vsyncpa [#allocation4 + $0x1], 0 }
   0x2   :  { %12 = vsyncpa [#allocation7], 0 }
   0x3   :  { %14 = vsyncpa [#allocation7 + $0x1], 0 }
   0x4   :  { %15 = vsyncpa [#allocation5], 0 }
   0x5   :  { %17 = vsyncpa [#allocation5 + $0x1], 0 }
   0x6   :  { %18 = vsyncpa [#allocation10], 0 }
   0x7   :  { %20 = vsyncpa [#allocation10 + $0x1], 0  ;;  %s790_s12 = smov 0   ;;  %s792_s13 = smov 0  }
   0x8   :  { %s794_s14 = smov 0   ;;  %s796_s15 = smov 0  }
   0x9   :  { %s798_s16 = smov 0   ;;  %s800_s17 = smov 0  }
   0xa LB: > { %s485_s18 = sadd.s32 4294967295, %s761_s17   ;;  %s486_s19 = sadd.s32 4294967294, %s761_s17   ;;  %s761_s17 = sphi %s800_s17, %s26_s17   ;;  %s757_s16 = sphi %s798_s16, %s1096_s16   ;;  %s753_s15 = sphi %s796_s15, %s1095_s15   ;;  %s749_s14 = sphi %s794_s14, %s1094_s14   ;;  %s745_s13 = sphi %s792_s13, %s1093_s13   ;;  %s741_s12 = sphi %s790_s12, %s1092_s12  }
   0xb   : > { %s38_s20 = sadd.s32 1, %s757_s16  ;;  %s47_s21 = sadd.s32 1, %s749_s14 }
   0xc   : > { %p40_p0 = scmp.ge.s32.totalorder %s38_s20, 2  ;;  %p54_p1 = scmp.ne.s32.totalorder %s749_s14, %s745_s13 }
   0xd   : > { %p55_p2 = scmp.eq.s32.totalorder %s761_s17, 0  ;;  %p60_p3 = scmp.ne.s32.totalorder %s745_s13, %s741_s12 }
   0xe   : > { %s1098_s20 = smov (%p40_p0, %s38_s20), 0  ;;  %p61_p5 = scmp.eq.s32.totalorder %s485_s18, 0 }
   0xf   : > { %p831_p4 = por %p55_p2, %p54_p1  ;;  %s44_s23 = ssub.s32 %s757_s16, %s1098_s20 }
  0x10   : > { %p112_p6 = scmp.eq.s32.totalorder %s485_s18, 1  ;;  %p45_p7 = scmp.eq.s32.totalorder %s44_s23, 0 }
  0x11   : > { %p837_p8 = por %p61_p5, %p60_p3  ;;  %p118_p10 = scmp.eq.s32.totalorder %s486_s19, 1 }
  0x12   : > { %p841_p9 = por %p112_p6, %p54_p1  ;;  %p530_p13 = scmp.lt.s32.totalorder %s761_s17, 2 }
  0x13   : > { %s1082_s24 = scalar_select %p837_p8, 1, 0 }
  0x14   : > { %s1083_s25 = scalar_select %p841_p9, 1, 0 }
  0x15   : > { %s846_s26 = scalar_select %p45_p7, %s749_s14, %s47_s21  }
  0x16   : > { %p848_p11 = por %p118_p10, %p60_p3  ;;  %s855_s28 = sand.u32 1, %s749_s14  }
  0x17   : > { %s489_s29 = sshll.u32 %s855_s28, 4  ;;  %s502_s30 = sshll.u32 %s757_s16, 10 }
  0x18   : > { %s1084_s27 = scalar_select %p848_p11, 1, 0 }
  0x19   : > { %s864_s6 = scalar_lea.hbm %s1075_s0, %s502_s30  ;;  %s168_s7 = scalar_lea.vmem [#allocation3], %s489_s29 }
  0x1a   : > { %s176_s8 = sshll.u32 %s168_s7, 4  ;;  %p872_p0 = pnand %p530_p13, %p831_p4  ;;  %s868_s8 = int_to_ptr.vmem [resolvable:$true] %s176_s8 }
  0x1b   : > { %s165_s10 = scalar_lea.sflag [#allocation4], %s855_s28  ;;  %s583_s11 = scalar_lea.hbm %s864_s6, 256 }
  0x1c   : > { %p584_p2 = scmp.ne.s32.totalorder %s864_s6, %s583_s11  ;;  %p585_p3 = pneg %p872_p0 }
  0x1d   : > { %s588_s21 = scalar_lea.hbm %s1075_s0, 2048  ;;  %p589_p4 = scmp.lt.u32.totalorder %s864_s6, %s1075_s0 }
  0x1e   : > { %p586_p5 = pnand %p585_p3, %p584_p2  ;;  %p590_p7 = scmp.lt.u32.totalorder %s588_s21, %s583_s11 }
  0x1f   : > { %p592_p13 = scmp.lt.u32.totalorder %s583_s11, %s864_s6 }
  0x20   : > { %p587_p6 = pneg %p586_p5  ;;  %p591_p10 = por %p590_p7, %p589_p4 }
  0x22   : > { %p593_p12 = por %p592_p13, %p591_p10 }
  0x24   : > { %p594_p1 = pnand %p593_p12, %p587_p6 }
  0x26   : > { %597 = shalt.err (!%p594_p1)
}
  0x27   : > { %s598_s4 = scalar_lea.vmem %s868_s8, 256  ;;  %s763_s5 = smov [#allocation3]  }
  0x28   : > { %p599_p2 = scmp.ne.s32.totalorder %s868_s8, %s598_s4  ;;  %s603_s7 = sshll.u32 %s763_s5, 4  ;;  %s604_s7 = int_to_ptr.vmem [resolvable:$false] %s603_s7 }
  0x29   : > { %s605_s18 = scalar_lea.vmem %s604_s7, 512  ;;  %p606_p9 = scmp.lt.s32.totalorder %s868_s8, %s604_s7 }
  0x2a   : > { %p601_p5 = pnand %p599_p2, %p585_p3  ;;  %p607_p4 = scmp.lt.s32.totalorder %s605_s18, %s598_s4 }
  0x2c   : > { %p602_p11 = pneg %p601_p5  ;;  %p608_p7 = por %p607_p4, %p606_p9 }
  0x2e   : > { %p609_p10 = pnand %p608_p7, %p602_p11 }
  0x30   : > { %612 = shalt.err (!%p609_p10)
}
  0x31   : > { %s764_s11 = smov 128   ;;  %s765_s19 = smov 8  }
  0x32   : > { %519 = dma.hbm_to_vmem [thread:$0]  (!%p872_p0), %s864_s6, 256, %s868_s8, %s165_s10, %s764_s11, %s764_s11, %s765_s19  }
  0x33   : > { %p206_p9 = scmp.lt.s32.totalorder %s761_s17, 3  ;;  %s914_s23 = scalar_lea.hbm %s1076_s1, %s502_s30 }
  0x34   : > { %p1086_p11 = scmp.ge.s32.totalorder %s761_s17, 1  ;;  %s190_s5 = scalar_lea.vmem [#allocation6], %s489_s29 }
  0x35   : > { %s198_s7 = sshll.u32 %s190_s5, 4  ;;  %s187_s6 = scalar_lea.sflag [#allocation7], %s855_s28  ;;  %s924_s7 = int_to_ptr.vmem [resolvable:$true] %s198_s7 }
  0x36   : > { %p918_p12 = pnand %p1086_p11, %p206_p9  ;;  %s613_s8 = scalar_lea.hbm %s914_s23, 256 }
  0x37   : > { %p614_p1 = scmp.ne.s32.totalorder %s914_s23, %s613_s8  ;;  %s618_s18 = scalar_lea.hbm %s1076_s1, 2048 }
  0x38   : > { %p619_p2 = scmp.lt.u32.totalorder %s914_s23, %s1076_s1  ;;  %p620_p5 = scmp.lt.u32.totalorder %s618_s18, %s613_s8 }
  0x39   : > { %p616_p6 = pnand %p614_p1, %p585_p3  ;;  %p622_p7 = scmp.lt.u32.totalorder %s613_s8, %s914_s23 }
  0x3a   : > { %p621_p4 = por %p620_p5, %p619_p2 }
  0x3b   : > { %p617_p13 = pneg %p616_p6 }
  0x3c   : > { %p623_p10 = por %p622_p7, %p621_p4 }
  0x3e   : > { %p624_p9 = pnand %p623_p10, %p617_p13 }
  0x40   : > { %627 = shalt.err (!%p624_p9)
}
  0x41   : > { %s628_s29 = scalar_lea.vmem %s924_s7, 256  ;;  %s766_s5 = smov [#allocation6]  }
  0x42   : > { %p629_p11 = scmp.ne.s32.totalorder %s924_s7, %s628_s29  ;;  %s633_s30 = sshll.u32 %s766_s5, 4  ;;  %s634_s30 = int_to_ptr.vmem [resolvable:$false] %s633_s30 }
  0x43   : > { %s635_s10 = scalar_lea.vmem %s634_s30, 512  ;;  %p636_p8 = scmp.lt.s32.totalorder %s924_s7, %s634_s30 }
  0x44   : > { %p631_p1 = pnand %p629_p11, %p585_p3  ;;  %p637_p2 = scmp.lt.s32.totalorder %s635_s10, %s628_s29 }
  0x46   : > { %p632_p6 = pneg %p631_p1  ;;  %p638_p5 = por %p637_p2, %p636_p8 }
  0x48   : > { %p639_p4 = pnand %p638_p5, %p632_p6 }
  0x4a   : > { %642 = shalt.err (!%p639_p4)
}
  0x4b   : > { %522 = dma.hbm_to_vmem [thread:$0]  (!%p872_p0), %s914_s23, 256, %s924_s7, %s187_s6, %s764_s11, %s764_s11, %s765_s19  }
  0x4c   : > { %210 = sbr.rel (%p918_p12) target bundleno = 351 (0x15f), region = 28  ;;  %s958_s8 = sand.u32 (!%p918_p12), 1, %s745_s13  }
  0x4d   : > { %s496_s18 = sshll.u32 (!%p918_p12), %s958_s8, 4  ;;  %s213_s21 = scalar_lea.sflag (!%p918_p12), [#allocation4], %s958_s8 }
  0x4e   : > { %s216_s9 = scalar_lea.vmem (!%p918_p12), [#allocation3], %s496_s18  ;;  %p1088_p8 = scmp.ne.s32.totalorder (!%p918_p12), %s1082_s24, 0 }
  0x53   : > { %724 = dma.done.wait (%p1088_p8), %s213_s21, 256  }
  0x54   : > { %726 = vsyncadd (%p1088_p8), %s213_s21, 4294967040  ;;  %s222_s28 = scalar_lea.sflag [#allocation7], %s958_s8  ;;  %s225_s11 = scalar_lea.vmem [#allocation6], %s496_s18 }
  0x55   : > { %728 = dma.done.wait (%p1088_p8), %s222_s28, 256  }
  0x56   : > { %730 = vsyncadd (%p1088_p8), %s222_s28, 4294967040  ;;  %vm262_vm0 = vcmask 130048   ;;  %v767_v0 = vmov 0.0   ;;  %v267_v1 = vld [vmem:[%s216_s9] sm:$0xff]  ;;  %v268_v2 = vld [vmem:[%s216_s9 + $0x8] sm:$0xff]  ;;  %s498_s24 = sshll.u32 %s753_s15, 4 }
  0x57   : > { %263 = vst.msk [vmem:[#allocation2] sm:$0xff] %vm262_vm0, %v767_v0  ;;  %264 = vst.msk [vmem:[#allocation2 + $0x8] sm:$0xff] %vm262_vm0, %v767_v0  ;;  %v269_v3 = vld [vmem:[%s225_s11] sm:$0xff]  ;;  %v270_v4 = vld [vmem:[%s225_s11 + $0x8] sm:$0xff]  ;;  %s249_s19 = scalar_lea.vmem [#allocation8], %s958_s8  ;;  %s255_s4 = scalar_lea.vmem [#allocation9], %s958_s8 }
  0x58   : > { %265 = vst.msk [vmem:[#allocation2 + $0x10] sm:$0xff] %vm262_vm0, %v767_v0  ;;  %266 = vst.msk [vmem:[#allocation2 + $0x18] sm:$0xff] %vm262_vm0, %v767_v0  ;;  %v273_v7 = vmul.f32 %v269_v3, %v267_v1  ;;  %v285_v8 = vadd.f32 %v269_v3, %v267_v1  ;;  %v274_v9 = vmul.f32 %v270_v4, %v268_v2  ;;  %s345_s23 = sshll.u32 %s249_s19, 4  ;;  %s358_s7 = sshll.u32 %s255_s4, 4  ;;  %s995_s23 = int_to_ptr.vmem [resolvable:$true] %s345_s23  ;;  %s997_s7 = int_to_ptr.vmem [resolvable:$true] %s358_s7 }
  0x59   : > { %v286_v12 = vadd.f32 %v270_v4, %v268_v2  ;;  %s993_s29 = scalar_lea.hbm %s1077_s2, %s498_s24  ;;  %s329_s30 = scalar_lea.sflag [#allocation5], %s958_s8 }
  0x5a   : > { %s643_s10 = scalar_lea.vmem %s995_s23, 16  ;;  %p1089_p3 = scmp.ne.s32.totalorder %s1083_s25, 0 }
  0x5b   : > { %p644_p0 = scmp.ne.s32.totalorder %s995_s23, %s643_s10  ;;  %s768_s18 = smov [#allocation8]  }
  0x5c   : > { %s647_s21 = sshll.u32 %s768_s18, 4  ;;  %s648_s21 = int_to_ptr.vmem [resolvable:$false] %s647_s21 }
  0x5d   : > { %p645_p12 = pnand %p644_p0, %p1089_p3  ;;  %s649_s9 = scalar_lea.vmem %s648_s21, 32 }
  0x5e   : > { %v271_v5 = vld [vmem:[#allocation2] sm:$0xff]  ;;  %v272_v6 = vld [vmem:[#allocation2 + $0x8] sm:$0xff]  ;;  %p650_p7 = scmp.lt.s32.totalorder %s995_s23, %s648_s21  ;;  %p651_p10 = scmp.lt.s32.totalorder %s649_s9, %s643_s10 }
  0x5f   : > { %v283_v10 = vld [vmem:[#allocation2 + $0x10] sm:$0xff]  ;;  %v284_v11 = vld [vmem:[#allocation2 + $0x18] sm:$0xff]  ;;  %v277_v13 = vadd.f32 %v273_v7, %v271_v5  ;;  %v278_v15 = vadd.f32 %v274_v9, %v272_v6  ;;  %p646_p13 = pneg %p645_p12 }
  0x60   : > { %v289_v14 = vadd.f32 %v285_v8, %v283_v10  ;;  %v290_v16 = vadd.f32 %v286_v12, %v284_v11  ;;  %p652_p9 = por %p651_p10, %p650_p7 }
  0x61   : > { %280 = vst.msk [vmem:[#allocation2] sm:$0xff] %vm262_vm0, %v277_v13  ;;  %281 = vst.msk [vmem:[#allocation2 + $0x8] sm:$0xff] %vm262_vm0, %v278_v15 }
  0x62   : > { %291 = vst.msk [vmem:[#allocation2 + $0x10] sm:$0xff] %vm262_vm0, %v289_v14  ;;  %292 = vst.msk [vmem:[#allocation2 + $0x18] sm:$0xff] %vm262_vm0, %v290_v16  ;;  %p653_p11 = pnand %p652_p9, %p646_p13 }
  0x68   : > { %v296_v17 = vld [vmem:[#allocation2] sm:$0xff]  ;;  %v297_v19 = vld [vmem:[#allocation2 + $0x8] sm:$0xff] }
  0x69   : > { %v310_v18 = vld [vmem:[#allocation2 + $0x10] sm:$0xff]  ;;  %v298_v20 = vsel %vm262_vm0, %v296_v17, 0.0  ;;  %v311_v21 = vld [vmem:[#allocation2 + $0x18] sm:$0xff]  ;;  %v299_v22 = vsel %vm262_vm0, %v297_v19, 0.0 }
  0x6a   : > { %v312_v23 = vsel %vm262_vm0, %v310_v18, 0.0  ;;  %v313_v24 = vsel %vm262_vm0, %v311_v21, 0.0  ;;  %v300_v25 = vadd.f32 %v299_v22, %v298_v20 }
  0x6b   : > { %v314_v26 = vadd.f32 %v313_v24, %v312_v23 }
  0x6c   : > { %301 = vadd.xlane.f32.xlu0 %v300_v25 }
  0x70   : > { %315 = vadd.xlane.f32.xlu0 %v314_v26 }
  0xf9   : > { %v302_v27 = vpop.xlane.xlu0 %301 }
  0xfa   : > { %v303_v28 = vrot.slane %v302_v27, 4 }
  0xfc   : > { %v304_v29 = vadd.f32 %v303_v28, %v302_v27 }
  0xfd   : > { %v316_v30 = vpop.xlane.xlu0 %315 }
  0xfe   : > { %v305_v31 = vrot.slane %v304_v29, 2  ;;  %v317_v32 = vrot.slane %v316_v30, 4 }
 0x100   : > { %v318_v33 = vadd.f32 %v317_v32, %v316_v30  ;;  %v306_v34 = vadd.f32 %v305_v31, %v304_v29 }
 0x102   : > { %v319_v35 = vrot.slane %v318_v33, 2  ;;  %v307_v36 = vrot.slane %v306_v34, 1 }
 0x104   : > { %v320_v37 = vadd.f32 %v319_v35, %v318_v33  ;;  %v308_v38 = vadd.f32 %v307_v36, %v306_v34 }
 0x106   : > { %504 = vpush %v308_v38  ;;  %v321_v39 = vrot.slane %v320_v37, 1 }
 0x108   : > { %v322_v40 = vadd.f32 %v321_v39, %v320_v37 }
 0x10a   : > { %506 = vpush %v322_v40 }
 0x137   : > { %s505_s5 = spop %504 }
 0x138   : > { %v324_v41 = vstv %s505_s5 }
 0x139   : > { %325 = vst [vmem:[%s249_s19] sm:$0x1] %v324_v41 }
 0x13a   : > { %656 = shalt.err (!%p653_p11)
}
 0x13b   : > { %s657_s28 = scalar_lea.hbm %s993_s29, 16  ;;  %s661_s6 = scalar_lea.hbm %s1077_s2, 32 }
 0x13c   : > { %p658_p1 = scmp.ne.s32.totalorder %s993_s29, %s657_s28  ;;  %p662_p5 = scmp.lt.u32.totalorder %s993_s29, %s1077_s2 }
 0x13d   : > { %p663_p4 = scmp.lt.u32.totalorder %s661_s6, %s657_s28  ;;  %p665_p0 = scmp.lt.u32.totalorder %s657_s28, %s993_s29 }
 0x13e   : > { %p659_p6 = pnand %p658_p1, %p1089_p3 }
 0x13f   : > { %p664_p8 = por %p663_p4, %p662_p5 }
 0x140   : > { %p660_p2 = pneg %p659_p6 }
 0x141   : > { %p666_p12 = por %p665_p0, %p664_p8 }
 0x143   : > { %p667_p13 = pnand %p666_p12, %p660_p2 }
 0x145   : > { %670 = shalt.err (!%p667_p13)
}
 0x146   : > { %512 = dma.vmem_to_hbm [thread:$0]  (%p1089_p3), %s995_s23, 16, %s993_s29, %s329_s30  }
 0x147   : > { %s507_s10 = spop %506  ;;  %s1026_s9 = scalar_lea.hbm %s1078_s3, %s498_s24 }
 0x148   : > { %v326_v42 = vstv %s507_s10  ;;  %s333_s28 = scalar_lea.sflag [#allocation10], %s958_s8  ;;  %s671_s11 = scalar_lea.vmem %s997_s7, 16 }
 0x149   : > { %327 = vst [vmem:[%s255_s4] sm:$0x1] %v326_v42  ;;  %p672_p7 = scmp.ne.s32.totalorder %s997_s7, %s671_s11  ;;  %s769_s19 = smov [#allocation9]  }
 0x14a   : > { %s675_s6 = sshll.u32 %s769_s19, 4  ;;  %s676_s6 = int_to_ptr.vmem [resolvable:$false] %s675_s6 }
 0x14b   : > { %p673_p10 = pnand %p672_p7, %p1089_p3  ;;  %s677_s23 = scalar_lea.vmem %s676_s6, 32 }
 0x14c   : > { %p678_p11 = scmp.lt.s32.totalorder %s997_s7, %s676_s6  ;;  %p679_p1 = scmp.lt.s32.totalorder %s677_s23, %s671_s11 }
 0x14d   : > { %p674_p9 = pneg %p673_p10 }
 0x14e   : > { %p680_p6 = por %p679_p1, %p678_p11 }
 0x150   : > { %p681_p2 = pnand %p680_p6, %p674_p9 }
 0x152   : > { %684 = shalt.err (!%p681_p2)
}
 0x153   : > { %s685_s15 = scalar_lea.hbm %s1026_s9, 16  ;;  %s689_s4 = scalar_lea.hbm %s1078_s3, 32 }
 0x154   : > { %p686_p5 = scmp.ne.s32.totalorder %s1026_s9, %s685_s15  ;;  %p690_p0 = scmp.lt.u32.totalorder %s1026_s9, %s1078_s3 }
 0x155   : > { %p691_p12 = scmp.lt.u32.totalorder %s689_s4, %s685_s15  ;;  %p693_p7 = scmp.lt.u32.totalorder %s685_s15, %s1026_s9 }
 0x156   : > { %p687_p4 = pnand %p686_p5, %p1089_p3 }
 0x157   : > { %p692_p13 = por %p691_p12, %p690_p0 }
 0x158   : > { %p688_p8 = pneg %p687_p4 }
 0x159   : > { %p694_p10 = por %p693_p7, %p692_p13 }
 0x15b   : > { %p695_p9 = pnand %p694_p10, %p688_p8 }
 0x15d   : > { %698 = shalt.err (!%p695_p9)
}
 0x15e   : > { %513 = dma.vmem_to_hbm [thread:$0]  (%p1089_p3), %s997_s7, 16, %s1026_s9, %s333_s28  }
 0x15f PF: > { %s370_s22 = sand.u32 1, %s741_s12   ;;  %p1090_p11 = scmp.ne.s32.totalorder %s1084_s27, 0 }
 0x160   : > { %p1091_p1 = scmp.ge.s32.totalorder %s761_s17, 2  ;;  %s371_s5 = scalar_lea.sflag [#allocation5], %s370_s22 }
 0x162   : > { %p524_p6 = pnand %p1091_p1, %p1090_p11 }
 0x164   : > { %732 = dma.done.wait (!%p524_p6), %s371_s5, 16  }
 0x165   : > { %734 = vsyncadd (!%p524_p6), %s371_s5, 4294967280  ;;  %s379_s10 = scalar_lea.sflag [#allocation10], %s370_s22 }
 0x166   : > { %736 = dma.done.wait (!%p524_p6), %s379_s10, 16  }
 0x167   : > { %738 = vsyncadd (!%p524_p6), %s379_s10, 4294967280  ;;  %s26_s17 = sadd.s32 1, %s761_s17   ;;  %s1092_s12 = smov %s745_s13 }
 0x168   : > { %p23_p2 = scmp.ge.s32.totalorder %s26_s17, 4   ;;  %s1093_s13 = smov %s749_s14 }
 0x169   : > { %s1094_s14 = smov %s846_s26  ;;  %s1095_s15 = smov %s757_s16 }
 0x16a   : > { %s1096_s16 = smov %s1098_s20  ;;  %25 = sbr.rel (!%p23_p2) target bundleno = 10 (0xa), region = 112 }
 0x171   :  { %383 = vsyncpa [#allocation4], 1 }
 0x172   :  { %385 = vsyncpa [#allocation4 + $0x1], 1 }
 0x173   :  { %386 = vsyncpa [#allocation7], 1 }
 0x174   :  { %388 = vsyncpa [#allocation7 + $0x1], 1 }
 0x175   :  { %389 = vsyncpa [#allocation5], 1 }
 0x176   :  { %391 = vsyncpa [#allocation5 + $0x1], 1 }
 0x177   :  { %392 = vsyncpa [#allocation10], 1 }
 0x178   :  { %394 = vsyncpa [#allocation10 + $0x1], 1 }

</bundles_post_ra>
